<compile_context>
chip_gen: v5e
topology: v5e:2x2
jax: 0.10.0
libtpu: 0.0.40
codegen_flags: <defaults>
</compile_context>

<pallas_src>
import jax
import jax.numpy as jnp
import numpy as np
from jax.experimental import pallas as pl
from jax.experimental.pallas import tpu as pltpu


F_PAD = 512        # fc1 output features, padded 500 -> 512
NB = 256           # per-grid-step block of fc1 output features
N_BLK = F_PAD // NB


def simple0_kernel(x_ref, w1_ref, b1_ref, wc_ref, p_ref):
    """One 256-wide slab of fc1 features -> partial fused-fc2/li output.

    x_ref : (2B, 1000)  rows 0:B = [s1|ref], rows B:2B = [s2|ref]
    w1_ref: (1000, NB)  fc1 weight slab (zero-padded cols >= 500)
    b1_ref: (1, NB)     fc1 bias slab (zero-padded)
    wc_ref: (NB, 6)     cols 0:3 = w2@wl[0:1] slab, cols 3:6 = w2@wl[1:2] slab
    p_ref : (2B, 6)     partial contribution of this feature slab
    """
    # fc1 slab + tanh, one dense (2B, NB) pass.  Dropout(0.5) -> identity.
    h = jnp.tanh(
        jnp.dot(x_ref[...], w1_ref[...], preferred_element_type=jnp.float32)
        + b1_ref[...])                                            # (2B, NB)
    # fused fc2+li partial for this slab.
    p_ref[...] = jnp.dot(h, wc_ref[...],
                         preferred_element_type=jnp.float32)      # (2B, 6)


def prepare_simple0_params(params):
    """One-time weight preparation (do NOT call per forward pass).

    Zero-pads fc1 (500 -> 512 output features) for 256-wide blocking and
    fuses fc2+li into a single 512x6 weight plus one (1, 3) bias.
    Padded fc1 columns have zero weight and zero bias, so tanh(0)*0 = 0 and
    results are bit-exact.
    """
    w1, b1, w2, b2, wl, bl = params
    w1p = jnp.zeros((1000, F_PAD), jnp.float32).at[:, :500].set(
        jnp.asarray(w1, jnp.float32))
    b1p = jnp.zeros((1, F_PAD), jnp.float32).at[:, :500].set(
        jnp.asarray(b1, jnp.float32))
    wc1 = jnp.asarray(w2 @ wl[0:1, :], jnp.float32)               # (500, 3)
    wc2 = jnp.asarray(w2 @ wl[1:2, :], jnp.float32)               # (500, 3)
    wcp = (jnp.zeros((F_PAD, 6), jnp.float32)
           .at[:500, 0:3].set(wc1)
           .at[:500, 3:6].set(wc2))
    bc = (b2[0] * (wl[0, :] + wl[1, :]) + bl).reshape(1, 3).astype(jnp.float32)
    return (w1p, b1p, wcp, bc)


def simple0_forward(s1, s2, ref, prepped):
    w1p, b1p, wcp, bc = prepped
    B = s1.shape[0]
    K = w1p.shape[0]                                              # 1000

    # Stack both branches on the batch axis so fc1's weight is pushed through
    # the MXU once per slab for a single dense (2B, K) LHS.
    x12 = jnp.concatenate(
        [jnp.concatenate([s1, ref], axis=1),
         jnp.concatenate([s2, ref], axis=1)], axis=0)             # (2B, 1000)

    flops = (2 * (2 * B) * K * F_PAD          # fc1
             + 2 * (2 * B) * F_PAD * 6)       # fused fc2+li
    transcendentals = (2 * B) * F_PAD         # tanh
    bytes_accessed = 4 * (K * F_PAD + F_PAD + F_PAD * 6
                          + (2 * B) * K + N_BLK * (2 * B) * 6)

    parts = pl.pallas_call(
        simple0_kernel,
        out_shape=jax.ShapeDtypeStruct((N_BLK, 2 * B, 6), jnp.float32),
        grid=(N_BLK,),
        in_specs=[
            # activations: constant block index -> DMA'd once, VMEM-resident
            pl.BlockSpec((2 * B, K), lambda k: (0, 0)),
            # weight slabs: streamed / double-buffered across the grid
            pl.BlockSpec((K, NB), lambda k: (0, k)),
            pl.BlockSpec((1, NB), lambda k: (0, k)),
            pl.BlockSpec((NB, 6), lambda k: (k, 0)),
        ],
        out_specs=pl.BlockSpec((None, 2 * B, 6), lambda k: (k, 0, 0)),
        compiler_params=pltpu.CompilerParams(
            dimension_semantics=("parallel",)),
        cost_estimate=pl.CostEstimate(flops=flops,
                                      transcendentals=transcendentals,
                                      bytes_accessed=bytes_accessed),
    )(x12, w1p, b1p, wcp)

    # Tiny epilogue (a few dozen floats) in the wrapper.
    p = jnp.sum(parts, axis=0)                                    # (2B, 6)
    z = p[0:B, 0:3] + p[B:2 * B, 3:6] + bc                        # (B, 3)
    return jax.nn.log_softmax(z, axis=-1)


def simple0_reference(s1, s2, ref, params):
    w1, b1, w2, b2, wl, bl = params
    inp1 = jnp.concatenate([s1, ref], axis=1)
    inp2 = jnp.concatenate([s2, ref], axis=1)

    def mlp(x):
        return jnp.tanh(x @ w1 + b1) @ w2 + b2

    out = jnp.concatenate([mlp(inp1), mlp(inp2)], axis=1) @ wl + bl
    return jax.nn.log_softmax(out, axis=1)


def make_params(key):
    k1, k2, k3, k4, k5, k6 = jax.random.split(key, 6)
    # fc1: Linear(1000, 500); fc2: Linear(500, 1); li: Linear(2, 3)
    w1 = jax.random.normal(k1, (1000, 500), jnp.float32) * 0.02
    b1 = jax.random.normal(k2, (500,), jnp.float32) * 0.02
    w2 = jax.random.normal(k3, (500, 1), jnp.float32) * 0.02
    b2 = jax.random.normal(k4, (1,), jnp.float32) * 0.02
    wl = jax.random.normal(k5, (2, 3), jnp.float32) * 0.5
    bl = jax.random.normal(k6, (3,), jnp.float32) * 0.5
    return (w1, b1, w2, b2, wl, bl)


if __name__ == "__main__":
    key = jax.random.PRNGKey(0)
    kp, ks1, ks2, kr = jax.random.split(key, 4)

    B = 4
    # s1, s2, ref each carry 500 features so cat([s, ref], 1) has 1000 = fc1 in-dim.
    s1 = jax.random.normal(ks1, (B, 500), jnp.float32)
    s2 = jax.random.normal(ks2, (B, 500), jnp.float32)
    ref = jax.random.normal(kr, (B, 500), jnp.float32)

    params = make_params(kp)
    prepped = jax.block_until_ready(prepare_simple0_params(params))  # one-time prep

    out = simple0_forward(s1, s2, ref, prepped)
    out = jax.block_until_ready(out)

    expected = jax.block_until_ready(simple0_reference(s1, s2, ref, params))
    assert out.shape == (B, 3), out.shape
    np.testing.assert_allclose(np.asarray(out), np.asarray(expected),
                               rtol=1e-3, atol=1e-3)
    print("KERNEL_OK")
</pallas_src>

<mosaic_0001>
module attributes {stable_mosaic.version = 11 : i64} {
  func.func @simple0_kernel(%arg0: i32, %arg1: memref<8x1000xf32, #tpu.memory_space<vmem>>, %arg2: memref<1000x256xf32, #tpu.memory_space<vmem>>, %arg3: memref<1x256xf32, #tpu.memory_space<vmem>>, %arg4: memref<256x6xf32, #tpu.memory_space<vmem>>, %arg5: memref<1x8x6xf32, #tpu.memory_space<vmem>>) attributes {dimension_semantics = [#tpu.dimension_semantics<parallel>], iteration_bounds = array<i64: 2>, scalar_prefetch = 0 : i64, scratch_operands = 0 : i64, tpu.core_type = #tpu.core_type<tc>, window_params = [{pipeline_mode = #tpu.pipeline_mode<synchronous>, transform_indices = @transform_0, window_bounds = array<i64: 8, 1000>}, {transform_indices = @transform_1, window_bounds = array<i64: 1000, 256>}, {transform_indices = @transform_2, window_bounds = array<i64: 1, 256>}, {transform_indices = @transform_3, window_bounds = array<i64: 256, 6>}, {transform_indices = @transform_4, window_bounds = array<i64: 1, 8, 6>}]} {
    %c0 = arith.constant 0 : index
    %c0_0 = arith.constant 0 : index
    %0 = vector.load %arg1[%c0, %c0_0] : memref<8x1000xf32, #tpu.memory_space<vmem>>, vector<8x1000xf32>
    %c0_1 = arith.constant 0 : index
    %c0_2 = arith.constant 0 : index
    %1 = vector.load %arg2[%c0_1, %c0_2] : memref<1000x256xf32, #tpu.memory_space<vmem>>, vector<1000x256xf32>
    %cst = arith.constant dense<0.000000e+00> : vector<8x256xf32>
    %2 = tpu.matmul %0, %1, %cst {dimension_numbers = #tpu.dot_dimension_numbers<[1], [0], [0], [1], [0, 0, 1, 1], [], []>} : vector<8x1000xf32>, vector<1000x256xf32>, vector<8x256xf32> -> vector<8x256xf32>
    %c0_3 = arith.constant 0 : index
    %c0_4 = arith.constant 0 : index
    %3 = vector.load %arg3[%c0_3, %c0_4] : memref<1x256xf32, #tpu.memory_space<vmem>>, vector<1x256xf32>
    %4 = vector.broadcast %3 : vector<1x256xf32> to vector<8x256xf32>
    %5 = arith.addf %2, %4 : vector<8x256xf32>
    %6 = math.tanh %5 : vector<8x256xf32>
    %c0_5 = arith.constant 0 : index
    %c0_6 = arith.constant 0 : index
    %7 = vector.load %arg4[%c0_5, %c0_6] : memref<256x6xf32, #tpu.memory_space<vmem>>, vector<256x6xf32>
    %cst_7 = arith.constant dense<0.000000e+00> : vector<8x6xf32>
    %8 = tpu.matmul %6, %7, %cst_7 {dimension_numbers = #tpu.dot_dimension_numbers<[1], [0], [0], [1], [0, 0, 1, 1], [], []>} : vector<8x256xf32>, vector<256x6xf32>, vector<8x6xf32> -> vector<8x6xf32>
    %c0_8 = arith.constant 0 : index
    %c0_9 = arith.constant 0 : index
    %c0_10 = arith.constant 0 : index
    %9 = vector.load %arg5[%c0_8, %c0_9, %c0_10] : memref<1x8x6xf32, #tpu.memory_space<vmem>>, vector<1x8x6xf32>
    %10 = vector.shape_cast %9 : vector<1x8x6xf32> to vector<8x6xf32>
    %11 = vector.shape_cast %8 : vector<8x6xf32> to vector<1x8x6xf32>
    tpu.vector_store %arg5[%c0_8, %c0_9, %c0_10], %11 {strides = array<i32>} : memref<1x8x6xf32, #tpu.memory_space<vmem>>, vector<1x8x6xf32>,
    return
  }
  func.func @transform_0(%arg0: i32) -> (i32, i32) {
    %c0_i32 = arith.constant 0 : i32
    %c0_i32_0 = arith.constant 0 : i32
    %c0_i32_1 = arith.constant 0 : i32
    return %c0_i32, %c0_i32_0 : i32, i32
  }
  func.func @transform_1(%arg0: i32) -> (i32, i32) {
    %c0_i32 = arith.constant 0 : i32
    %c0_i32_0 = arith.constant 0 : i32
    return %c0_i32, %arg0 : i32, i32
  }
  func.func @transform_2(%arg0: i32) -> (i32, i32) {
    %c0_i32 = arith.constant 0 : i32
    %c0_i32_0 = arith.constant 0 : i32
    return %c0_i32, %arg0 : i32, i32
  }
  func.func @transform_3(%arg0: i32) -> (i32, i32) {
    %c0_i32 = arith.constant 0 : i32
    %c0_i32_0 = arith.constant 0 : i32
    return %arg0, %c0_i32 : i32, i32
  }
  func.func @transform_4(%arg0: i32) -> (i32, i32, i32) {
    %c0_i32 = arith.constant 0 : i32
    %c0_i32_0 = arith.constant 0 : i32
    %c0_i32_1 = arith.constant 0 : i32
    return %arg0, %c0_i32, %c0_i32_0 : i32, i32, i32
  }
}

</mosaic_0001>

<bundles_post_ra>
// kernel: tpu_custom_call.1
= control target key start
LH: loop header
LB: loop body
LE: loop exit
PB: predicated region body
PF: predicated region fallthrough
CT: control target
= control target key end

     0   :  { %9 = vsyncpa [#allocation3], 0  ;;  %s1776_s0 = inlined_call_operand.hbm [shape: f32[8,1000], index: 0, kind: input, shape index: {}]   ;;  %s1777_s1 = inlined_call_operand.hbm [shape: f32[1000,512], index: 1, kind: input, shape index: {}]   ;;  %s1778_s2 = inlined_call_operand.hbm [shape: f32[1,512], index: 2, kind: input, shape index: {}]   ;;  %s1779_s3 = inlined_call_operand.vmem [shape: f32[512,6], index: 3, kind: input, shape index: {}]   ;;  %s1780_s4 = inlined_call_operand.vmem [shape: f32[2,8,6], index: 4, kind: output, shape index: {}]  }
   0x1   :  { %10 = vsyncpa [#allocation5], 0 }
   0x2   :  { %12 = vsyncpa [#allocation5 + $0x1], 0  ;;  %s1308_s15 = smov 0   ;;  %s1310_s16 = smov 0  }
   0x3   :  { %s1312_s17 = smov 0   ;;  %s1314_s18 = smov 0  }
   0x4 LB: > { %s1329_s19 = sadd.s32 1, %s1277_s18   ;;  %s46_s20 = sadd.s32 1, %s1273_s17  ;;  %s1277_s18 = sphi %s1314_s18, %s1788_s18   ;;  %s1273_s17 = sphi %s1312_s17, %s1787_s17   ;;  %s1269_s16 = sphi %s1310_s16, %s1786_s16   ;;  %s1265_s15 = sphi %s1308_s15, %s1785_s15  }
   0x5   : > { %s43_s21 = ssub.s32 %s1277_s18, %s1329_s19  ;;  %p53_p0 = scmp.ne.s32.totalorder %s1273_s17, %s1269_s16 }
   0x6   : > { %p44_p1 = scmp.eq.s32.totalorder %s43_s21, 0  ;;  %p54_p2 = scmp.eq.s32.totalorder %s1277_s18, 0 }
   0x7   : > { %p1107_p3 = scmp.lt.s32.totalorder %s1277_s18, 2  ;;  %s173_s23 = sand.u32 1, %s1277_s18  }
   0x8   : > { %s1339_s22 = scalar_select %p44_p1, %s1273_s17, %s46_s20  }
   0x9   : > { %p55_p4 = por %p54_p2, %p53_p0  ;;  %s175_s24 = sand.u32 1, %s1273_s17  }
   0xa   : > { %s1085_s25 = smul.u32 2000, %s175_s24  ;;  %s1084_s26 = sshll.u32 %s1277_s18, 4 }
   0xb   : > { %s182_s29 = scalar_lea.hbm %s1777_s1, %s1084_s26  ;;  %p1349_p5 = pnand %p1107_p3, %p55_p4 }
   0xc   : > { %s183_s5 = sshll.u32 %s182_s29, 4  ;;  %s177_s6 = scalar_lea.vmem [#allocation4], %s1085_s25  ;;  %s184_s5 = int_to_ptr.hbm [resolvable:$true] %s183_s5 }
   0xd   : > { %s185_s7 = sshll.u32 %s177_s6, 4  ;;  %s1353_s8 = scalar_lea.sflag [#allocation5], %s173_s23  ;;  %s186_s7 = int_to_ptr.vmem [resolvable:$true] %s185_s7 }
   0xe   : > { %s1149_s9 = sshra.s32 %s184_s5, 4  ;;  %p1153_p7 = pneg %p1349_p5  ;;  %s1150_s9 = int_to_ptr.hbm [resolvable:$true] %s1149_s9 }
   0xf   : > { %s1151_s10 = scalar_lea.hbm %s1150_s9, 2000  ;;  %s1156_s13 = scalar_lea.hbm %s1777_s1, 4000 }
  0x10   : > { %p1152_p6 = scmp.ne.s32.totalorder %s1150_s9, %s1151_s10  ;;  %p1157_p10 = scmp.lt.s32.totalorder %s1150_s9, %s1777_s1 }
  0x11   : > { %p1158_p11 = scmp.lt.s32.totalorder %s1156_s13, %s1151_s10 }
  0x12   : > { %p1154_p8 = pnand %p1153_p7, %p1152_p6 }
  0x13   : > { %p1159_p12 = por %p1158_p11, %p1157_p10 }
  0x14   : > { %p1155_p9 = pneg %p1154_p8 }
  0x16   : > { %p1160_p13 = pnand %p1159_p12, %p1155_p9 }
  0x18   : > { %1163 = shalt.err (!%p1160_p13)
}
  0x19   : > { %s1279_s21 = smov 512   ;;  %s1280_s23 = smov 256  }
  0x1a   : > { %s1281_s25 = smov 16   ;;  %s1370_s26 = sadd.s32 4294967295, %s1277_s18  }
  0x1b   : > { %1102 = dma.hbm_to_vmem [thread:$0]  (!%p1349_p5), %s184_s5, 32000, %s186_s7, %s1353_s8, %s1279_s21, %s1280_s23, %s1281_s25  }
  0x1c   : > { %p59_p0 = scmp.ne.s32.totalorder %s1269_s16, %s1265_s15  ;;  %p60_p1 = scmp.eq.s32.totalorder %s1370_s26, 0 }
  0x1d   : > { %p1067_p2 = scmp.ge.s32.totalorder %s1277_s18, 1  ;;  %p148_p3 = scmp.lt.s32.totalorder %s1277_s18, 3 }
  0x1e   : > { %p1379_p4 = por %p60_p1, %p59_p0  ;;  %s160_s6 = sshll.u32 %s1776_s0, 4  ;;  %s161_s6 = int_to_ptr.hbm [resolvable:$true] %s160_s6 }
  0x1f   : > { %p1383_p6 = pnand %p1067_p2, %p148_p3  ;;  %s1282_s15 = smov [#allocation2]  }
  0x20   : > { %s162_s7 = sshll.u32 %s1282_s15, 4  ;;  %s1072_s9 = sshll.u32 %s175_s24, 1  ;;  %s163_s7 = int_to_ptr.vmem [resolvable:$true] %s162_s7 }
  0x21   : > { %p1095_p8 = pneg %p1383_p6  ;;  %s1073_s10 = sshll.u32 %s1277_s18, 1 }
  0x22   : > { %s199_s11 = scalar_lea.vmem [#allocation6], %s1072_s9  ;;  %s203_s20 = scalar_lea.hbm %s1778_s2, %s1073_s10 }
  0x23   : > { %p1096_p9 = pnand %p1095_p8, %p60_p1  ;;  %s207_s12 = sshll.u32 %s199_s11, 4  ;;  %s208_s12 = int_to_ptr.vmem [resolvable:$true] %s207_s12 }
  0x24   : > { %s205_s21 = sshll.u32 %s203_s20, 4  ;;  %s1216_s29 = scalar_lea.hbm %s1778_s2, 4  ;;  %s206_s21 = int_to_ptr.hbm [resolvable:$true] %s205_s21 }
  0x25   : > { %1098 = dma.hbm_to_vmem [thread:$0]  (!%p1096_p9), %s161_s6, 1024, %s163_s7, [#allocation3]  }
  0x26   : > { %s1209_s23 = sshra.s32 %s206_s21, 4  ;;  %s1210_s23 = int_to_ptr.hbm [resolvable:$true] %s1209_s23 }
  0x27   : > { %s1211_s25 = scalar_lea.hbm %s1210_s23, 2  ;;  %p1217_p13 = scmp.lt.s32.totalorder %s1210_s23, %s1778_s2 }
  0x28   : > { %p1212_p10 = scmp.ne.s32.totalorder %s1210_s23, %s1211_s25  ;;  %p1218_p0 = scmp.lt.s32.totalorder %s1216_s29, %s1211_s25 }
  0x2a   : > { %p1214_p11 = pnand %p1212_p10, %p1153_p7  ;;  %p1219_p2 = por %p1218_p0, %p1217_p13 }
  0x2c   : > { %p1215_p12 = pneg %p1214_p11 }
  0x2e   : > { %p1220_p3 = pnand %p1219_p2, %p1215_p12 }
  0x30   : > { %1223 = shalt.err (!%p1220_p3)
}
  0x31   : > { %1105 = dma.hbm_to_vmem [thread:$0]  (!%p1349_p5), %s206_s21, 32, %s208_s12, %s1353_s8  }
  0x32   : > { %225 = sbr.rel (%p1383_p6) target bundleno = 470 (0x1d6), region = 36 }
  0x37   : > { %1256 = dma.done.wait (%p60_p1), [#allocation3], 1024  }
  0x38   : > { %1258 = vsyncadd (%p60_p1), [#allocation3], 4294966272  ;;  %s232_s6 = sand.u32 1, %s1370_s26   ;;  %s234_s7 = sand.u32 1, %s1269_s16  }
  0x39   : > { %s1086_s9 = smul.u32 2000, %s234_s7  ;;  %s233_s30 = scalar_lea.sflag [#allocation5], %s232_s6 }
  0x3b   : > { %s1422_s10 = scalar_lea.vmem [#allocation4], %s1086_s9 }
  0x3c   : > { %1260 = dma.done.wait (%p1379_p4), %s233_s30, 32032  }
  0x3d   : > { %1262 = vsyncadd (%p1379_p4), %s233_s30, 4294935264  ;;  %v395_v0 = vld [vmem:[%s1422_s10 + $0x2f0] sm:$0xff]  ;;  %v393_v3 = vld [vmem:[%s1422_s10 + $0x2e0] sm:$0xff]  ;;  %vm557_vm0 = vcmask 850944   ;;  %s1077_s8 = sshll.u32 %s1370_s26, 5  ;;  %s1076_s14 = sshll.u32 %s234_s7, 1 }
  0x3e   : > { %v427_v1 = vld [vmem:[%s1422_s10 + $0x3f0] sm:$0xff]  ;;  %601 = vmatpush.msra.mxu2 %v395_v0  ;;  %v425_v4 = vld [vmem:[%s1422_s10 + $0x3e0] sm:$0xff]  ;;  %p1685_p5 = scmp.lt.s32.totalorder %s1077_s8, 63  ;;  %s246_s20 = scalar_lea.vmem [#allocation6], %s1076_s14  ;;  %vm955_vm1 = vcmask 48128  }
  0x3f   : > { %v331_v2 = vld [vmem:[%s1422_s10 + $0xf0] sm:$0xff]  ;;  %621 = vmatpush.msra.mxu3 %v427_v1  ;;  %v329_v5 = vld [vmem:[%s1422_s10 + $0xe0] sm:$0xff]  ;;  %p289_p7 = scmp.lt.s32.totalorder %s1370_s26, 1 }
  0x40   : > { %561 = vmatpush.msra.mxu0 %v331_v2  ;;  %v363_v6 = vld [vmem:[%s1422_s10 + $0x1f0] sm:$0xff]  ;;  %602 = vmatpush.msra.mxu2 %v393_v3  ;;  %v361_v10 = vld [vmem:[%s1422_s10 + $0x1e0] sm:$0xff]  ;;  %s1790_s8 = smov (!%p1685_p5, %s1077_s8), 63 }
  0x41   : > { %v391_v7 = vld [vmem:[%s1422_s10 + $0x2d0] sm:$0xff]  ;;  %622 = vmatpush.msra.mxu3 %v425_v4  ;;  %581 = vmatpush.msra.mxu1 %v363_v6  ;;  %v389_v11 = vld [vmem:[%s1422_s10 + $0x2c0] sm:$0xff]  ;;  %s1078_s28 = sshll.u32 %s1790_s8, 3  ;;  %s1792_s26 = smov (!%p289_p7, %s1370_s26), 1 }
  0x42   : > { %v423_v8 = vld [vmem:[%s1422_s10 + $0x3d0] sm:$0xff]  ;;  %562 = vmatpush.msra.mxu0 %v329_v5  ;;  %v421_v12 = vld [vmem:[%s1422_s10 + $0x3c0] sm:$0xff]  ;;  %603 = vmatpush.msra.mxu2 %v391_v7  ;;  %s1715_s13 = scalar_lea.vmem %s1779_s3, %s1078_s28  ;;  %s1079_s21 = sshll.u32 %s1792_s26, 3 }
  0x43   : > { %v327_v9 = vld [vmem:[%s1422_s10 + $0xd0] sm:$0xff]  ;;  %623 = vmatpush.msra.mxu3 %v423_v8  ;;  %v325_v13 = vld [vmem:[%s1422_s10 + $0xc0] sm:$0xff]  ;;  %582 = vmatpush.msra.mxu1 %v361_v10  ;;  %s292_s24 = scalar_lea.vmem %s1780_s4, %s1079_s21 }
  0x44   : > { %v359_v14 = vld [vmem:[%s1422_s10 + $0x1d0] sm:$0xff]  ;;  %563 = vmatpush.msra.mxu0 %v327_v9  ;;  %604 = vmatpush.msra.mxu2 %v389_v11  ;;  %v357_v18 = vld [vmem:[%s1422_s10 + $0x1c0] sm:$0xff] }
  0x45   : > { %v387_v15 = vld [vmem:[%s1422_s10 + $0x2b0] sm:$0xff]  ;;  %624 = vmatpush.msra.mxu3 %v421_v12  ;;  %583 = vmatpush.msra.mxu1 %v359_v14  ;;  %v385_v19 = vld [vmem:[%s1422_s10 + $0x2a0] sm:$0xff] }
  0x46   : > { %v419_v16 = vld [vmem:[%s1422_s10 + $0x3b0] sm:$0xff]  ;;  %564 = vmatpush.msra.mxu0 %v325_v13  ;;  %v417_v20 = vld [vmem:[%s1422_s10 + $0x3a0] sm:$0xff]  ;;  %605 = vmatpush.msra.mxu2 %v387_v15 }
  0x47   : > { %v323_v17 = vld [vmem:[%s1422_s10 + $0xb0] sm:$0xff]  ;;  %625 = vmatpush.msra.mxu3 %v419_v16  ;;  %v321_v21 = vld [vmem:[%s1422_s10 + $0xa0] sm:$0xff]  ;;  %584 = vmatpush.msra.mxu1 %v357_v18 }
  0x48   : > { %v355_v22 = vld [vmem:[%s1422_s10 + $0x1b0] sm:$0xff]  ;;  %565 = vmatpush.msra.mxu0 %v323_v17  ;;  %606 = vmatpush.msra.mxu2 %v385_v19  ;;  %v353_v26 = vld [vmem:[%s1422_s10 + $0x1a0] sm:$0xff] }
  0x49   : > { %v383_v23 = vld [vmem:[%s1422_s10 + $0x290] sm:$0xff]  ;;  %626 = vmatpush.msra.mxu3 %v417_v20  ;;  %585 = vmatpush.msra.mxu1 %v355_v22  ;;  %v381_v27 = vld [vmem:[%s1422_s10 + $0x280] sm:$0xff] }
  0x4a   : > { %v415_v24 = vld [vmem:[%s1422_s10 + $0x390] sm:$0xff]  ;;  %566 = vmatpush.msra.mxu0 %v321_v21  ;;  %v413_v28 = vld [vmem:[%s1422_s10 + $0x380] sm:$0xff]  ;;  %607 = vmatpush.msra.mxu2 %v383_v23 }
  0x4b   : > { %v319_v25 = vld [vmem:[%s1422_s10 + $0x90] sm:$0xff]  ;;  %627 = vmatpush.msra.mxu3 %v415_v24  ;;  %v317_v29 = vld [vmem:[%s1422_s10 + $0x80] sm:$0xff]  ;;  %586 = vmatpush.msra.mxu1 %v353_v26 }
  0x4c   : > { %v351_v30 = vld [vmem:[%s1422_s10 + $0x190] sm:$0xff]  ;;  %567 = vmatpush.msra.mxu0 %v319_v25  ;;  %608 = vmatpush.msra.mxu2 %v381_v27  ;;  %v349_v34 = vld [vmem:[%s1422_s10 + $0x180] sm:$0xff] }
  0x4d   : > { %v379_v31 = vld [vmem:[%s1422_s10 + $0x270] sm:$0xff]  ;;  %628 = vmatpush.msra.mxu3 %v413_v28  ;;  %587 = vmatpush.msra.mxu1 %v351_v30  ;;  %v377_v35 = vld [vmem:[%s1422_s10 + $0x260] sm:$0xff] }
  0x4e   : > { %v411_v32 = vld [vmem:[%s1422_s10 + $0x370] sm:$0xff]  ;;  %568 = vmatpush.msra.mxu0 %v317_v29  ;;  %v409_v36 = vld [vmem:[%s1422_s10 + $0x360] sm:$0xff]  ;;  %609 = vmatpush.msra.mxu2 %v379_v31 }
  0x4f   : > { %v315_v33 = vld [vmem:[%s1422_s10 + $0x70] sm:$0xff]  ;;  %629 = vmatpush.msra.mxu3 %v411_v32  ;;  %v313_v37 = vld [vmem:[%s1422_s10 + $0x60] sm:$0xff]  ;;  %588 = vmatpush.msra.mxu1 %v349_v34 }
  0x50   : > { %v347_v38 = vld [vmem:[%s1422_s10 + $0x170] sm:$0xff]  ;;  %569 = vmatpush.msra.mxu0 %v315_v33  ;;  %610 = vmatpush.msra.mxu2 %v377_v35  ;;  %v345_v42 = vld [vmem:[%s1422_s10 + $0x160] sm:$0xff] }
  0x51   : > { %v375_v39 = vld [vmem:[%s1422_s10 + $0x250] sm:$0xff]  ;;  %630 = vmatpush.msra.mxu3 %v409_v36  ;;  %589 = vmatpush.msra.mxu1 %v347_v38  ;;  %v373_v43 = vld [vmem:[%s1422_s10 + $0x240] sm:$0xff] }
  0x52   : > { %v407_v40 = vld [vmem:[%s1422_s10 + $0x350] sm:$0xff]  ;;  %570 = vmatpush.msra.mxu0 %v313_v37  ;;  %v405_v44 = vld [vmem:[%s1422_s10 + $0x340] sm:$0xff]  ;;  %611 = vmatpush.msra.mxu2 %v375_v39 }
  0x53   : > { %v311_v41 = vld [vmem:[%s1422_s10 + $0x50] sm:$0xff]  ;;  %631 = vmatpush.msra.mxu3 %v407_v40  ;;  %v309_v45 = vld [vmem:[%s1422_s10 + $0x40] sm:$0xff]  ;;  %590 = vmatpush.msra.mxu1 %v345_v42 }
  0x54   : > { %v343_v46 = vld [vmem:[%s1422_s10 + $0x150] sm:$0xff]  ;;  %571 = vmatpush.msra.mxu0 %v311_v41  ;;  %612 = vmatpush.msra.mxu2 %v373_v43  ;;  %v341_v50 = vld [vmem:[%s1422_s10 + $0x140] sm:$0xff] }
  0x55   : > { %v371_v47 = vld [vmem:[%s1422_s10 + $0x230] sm:$0xff]  ;;  %632 = vmatpush.msra.mxu3 %v405_v44  ;;  %591 = vmatpush.msra.mxu1 %v343_v46  ;;  %v369_v51 = vld [vmem:[%s1422_s10 + $0x220] sm:$0xff] }
  0x56   : > { %v403_v48 = vld [vmem:[%s1422_s10 + $0x330] sm:$0xff]  ;;  %572 = vmatpush.msra.mxu0 %v309_v45  ;;  %v401_v52 = vld [vmem:[%s1422_s10 + $0x320] sm:$0xff]  ;;  %613 = vmatpush.msra.mxu2 %v371_v47 }
  0x57   : > { %v307_v49 = vld [vmem:[%s1422_s10 + $0x30] sm:$0xff]  ;;  %633 = vmatpush.msra.mxu3 %v403_v48  ;;  %v305_v53 = vld [vmem:[%s1422_s10 + $0x20] sm:$0xff]  ;;  %592 = vmatpush.msra.mxu1 %v341_v50 }
  0x58   : > { %v339_v54 = vld [vmem:[%s1422_s10 + $0x130] sm:$0xff]  ;;  %573 = vmatpush.msra.mxu0 %v307_v49  ;;  %614 = vmatpush.msra.mxu2 %v369_v51  ;;  %v337_v58 = vld [vmem:[%s1422_s10 + $0x120] sm:$0xff]  ;;  %v1546_v51 = vld [vmem:[#allocation2 + $0x18] sm:$0xff] }
  0x59   : > { %v367_v55 = vld [vmem:[%s1422_s10 + $0x210] sm:$0xff]  ;;  %634 = vmatpush.msra.mxu3 %v401_v52  ;;  %593 = vmatpush.msra.mxu1 %v339_v54  ;;  %v365_v59 = vld [vmem:[%s1422_s10 + $0x200] sm:$0xff] }
  0x5a   : > { %v399_v56 = vld [vmem:[%s1422_s10 + $0x310] sm:$0xff]  ;;  %574 = vmatpush.msra.mxu0 %v305_v53  ;;  %v397_v60 = vld [vmem:[%s1422_s10 + $0x300] sm:$0xff]  ;;  %615 = vmatpush.msra.mxu2 %v367_v55  ;;  %v332_v53 = vld [vmem:[%s1422_s10 + $0xf8] sm:$0xff] }
  0x5b   : > { %v303_v57 = vld [vmem:[%s1422_s10 + $0x10] sm:$0xff]  ;;  %635 = vmatpush.msra.mxu3 %v399_v56  ;;  %v549_v62 = vld [vmem:[%s1422_s10 + $0x7c0] sm:$0xff]  ;;  %594 = vmatpush.msra.mxu1 %v337_v58  ;;  %v1553_v56 = vld [vmem:[#allocation2 + $0x8] sm:$0xff] }
  0x5c   : > { %v523_v61 = vld [vmem:[%s1422_s10 + $0x6f0] sm:$0xff]  ;;  %575 = vmatpush.msra.mxu0 %v303_v57  ;;  %v301_v63 = vld [vmem:[%s1422_s10] sm:$0xff]  ;;  %616 = vmatpush.msra.mxu2 %v365_v59  ;;  %v330_v57 = vld [vmem:[%s1422_s10 + $0xe8] sm:$0xff] }
  0x5d   : > { %v335_v0 = vld [vmem:[%s1422_s10 + $0x110] sm:$0xff]  ;;  %636 = vmatpush.msra.mxu3 %v397_v60  ;;  %v521_v2 = vld [vmem:[%s1422_s10 + $0x6e0] sm:$0xff] }
  0x5e   : > { %v459_v1 = vld [vmem:[%s1422_s10 + $0x4f0] sm:$0xff]  ;;  %681 = vmatpush.msrb.mxu2 %v523_v61  ;;  %v333_v4 = vld [vmem:[%s1422_s10 + $0x100] sm:$0xff]  ;;  %576 = vmatpush.msra.mxu0 %v301_v63  ;;  %v328_v61 = vld [vmem:[%s1422_s10 + $0xd8] sm:$0xff] }
  0x5f   : > { %704 = vmatpush.msrb.mxu3 %v549_v62  ;;  %v547_v3 = vld [vmem:[%s1422_s10 + $0x7b0] sm:$0xff]  ;;  %595 = vmatpush.msra.mxu1 %v335_v0  ;;  %v457_v5 = vld [vmem:[%s1422_s10 + $0x4e0] sm:$0xff] }
  0x60   : > { %v491_v6 = vld [vmem:[%s1422_s10 + $0x5f0] sm:$0xff]  ;;  %641 = vmatpush.msrb.mxu0 %v459_v1  ;;  %682 = vmatpush.msrb.mxu2 %v521_v2  ;;  %v545_v8 = vld [vmem:[%s1422_s10 + $0x7a0] sm:$0xff]  ;;  %v326_v2 = vld [vmem:[%s1422_s10 + $0xc8] sm:$0xff] }
  0x61   : > { %v519_v7 = vld [vmem:[%s1422_s10 + $0x6d0] sm:$0xff]  ;;  %705 = vmatpush.msrb.mxu3 %v547_v3  ;;  %596 = vmatpush.msra.mxu1 %v333_v4  ;;  %v489_v10 = vld [vmem:[%s1422_s10 + $0x5e0] sm:$0xff] }
  0x62   : > { %v455_v9 = vld [vmem:[%s1422_s10 + $0x4d0] sm:$0xff]  ;;  %642 = vmatpush.msrb.mxu0 %v457_v5  ;;  %v517_v11 = vld [vmem:[%s1422_s10 + $0x6c0] sm:$0xff]  ;;  %683 = vmatpush.msrb.mxu2 %v519_v7  ;;  %v324_v7 = vld [vmem:[%s1422_s10 + $0xb8] sm:$0xff] }
  0x63   : > { %661 = vmatpush.msrb.mxu1 %v491_v6  ;;  %v543_v12 = vld [vmem:[%s1422_s10 + $0x790] sm:$0xff]  ;;  %706 = vmatpush.msrb.mxu3 %v545_v8  ;;  %v453_v13 = vld [vmem:[%s1422_s10 + $0x4c0] sm:$0xff]  ;;  %v1572_v6 = vld [vmem:[#allocation2 + $0x38] sm:$0xff] }
  0x64   : > { %v487_v14 = vld [vmem:[%s1422_s10 + $0x5d0] sm:$0xff]  ;;  %643 = vmatpush.msrb.mxu0 %v455_v9  ;;  %v541_v16 = vld [vmem:[%s1422_s10 + $0x780] sm:$0xff]  ;;  %684 = vmatpush.msrb.mxu2 %v517_v11  ;;  %v364_v8 = vld [vmem:[%s1422_s10 + $0x1f8] sm:$0xff] }
  0x65   : > { %662 = vmatpush.msrb.mxu1 %v489_v10  ;;  %v515_v15 = vld [vmem:[%s1422_s10 + $0x6b0] sm:$0xff]  ;;  %707 = vmatpush.msrb.mxu3 %v543_v12  ;;  %v485_v18 = vld [vmem:[%s1422_s10 + $0x5c0] sm:$0xff]  ;;  %v428_v10 = vld [vmem:[%s1422_s10 + $0x3f8] sm:$0xff] }
  0x66   : > { %v451_v17 = vld [vmem:[%s1422_s10 + $0x4b0] sm:$0xff]  ;;  %644 = vmatpush.msrb.mxu0 %v453_v13  ;;  %v513_v19 = vld [vmem:[%s1422_s10 + $0x6a0] sm:$0xff]  ;;  %685 = vmatpush.msrb.mxu2 %v515_v15  ;;  %v1582_v11 = vld [vmem:[#allocation2 + $0x28] sm:$0xff] }
  0x67   : > { %663 = vmatpush.msrb.mxu1 %v487_v14  ;;  %v539_v20 = vld [vmem:[%s1422_s10 + $0x770] sm:$0xff]  ;;  %708 = vmatpush.msrb.mxu3 %v541_v16  ;;  %v449_v21 = vld [vmem:[%s1422_s10 + $0x4a0] sm:$0xff]  ;;  %v322_v12 = vld [vmem:[%s1422_s10 + $0xa8] sm:$0xff] }
  0x68   : > { %v483_v22 = vld [vmem:[%s1422_s10 + $0x5b0] sm:$0xff]  ;;  %645 = vmatpush.msrb.mxu0 %v451_v17  ;;  %v537_v24 = vld [vmem:[%s1422_s10 + $0x760] sm:$0xff]  ;;  %686 = vmatpush.msrb.mxu2 %v513_v19  ;;  %v362_v13 = vld [vmem:[%s1422_s10 + $0x1e8] sm:$0xff] }
  0x69   : > { %664 = vmatpush.msrb.mxu1 %v485_v18  ;;  %v511_v23 = vld [vmem:[%s1422_s10 + $0x690] sm:$0xff]  ;;  %709 = vmatpush.msrb.mxu3 %v539_v20  ;;  %v481_v26 = vld [vmem:[%s1422_s10 + $0x5a0] sm:$0xff]  ;;  %v396_v14 = vld [vmem:[%s1422_s10 + $0x2f8] sm:$0xff] }
  0x6a   : > { %v447_v25 = vld [vmem:[%s1422_s10 + $0x490] sm:$0xff]  ;;  %646 = vmatpush.msrb.mxu0 %v449_v21  ;;  %v509_v27 = vld [vmem:[%s1422_s10 + $0x680] sm:$0xff]  ;;  %687 = vmatpush.msrb.mxu2 %v511_v23  ;;  %v320_v15 = vld [vmem:[%s1422_s10 + $0x98] sm:$0xff] }
  0x6b   : > { %665 = vmatpush.msrb.mxu1 %v483_v22  ;;  %v535_v28 = vld [vmem:[%s1422_s10 + $0x750] sm:$0xff]  ;;  %710 = vmatpush.msrb.mxu3 %v537_v24  ;;  %v445_v29 = vld [vmem:[%s1422_s10 + $0x480] sm:$0xff]  ;;  %v426_v16 = vld [vmem:[%s1422_s10 + $0x3e8] sm:$0xff] }
  0x6c   : > { %v479_v30 = vld [vmem:[%s1422_s10 + $0x590] sm:$0xff]  ;;  %647 = vmatpush.msrb.mxu0 %v447_v25  ;;  %v533_v32 = vld [vmem:[%s1422_s10 + $0x740] sm:$0xff]  ;;  %688 = vmatpush.msrb.mxu2 %v509_v27  ;;  %v360_v17 = vld [vmem:[%s1422_s10 + $0x1d8] sm:$0xff] }
  0x6d   : > { %666 = vmatpush.msrb.mxu1 %v481_v26  ;;  %v507_v31 = vld [vmem:[%s1422_s10 + $0x670] sm:$0xff]  ;;  %711 = vmatpush.msrb.mxu3 %v535_v28  ;;  %v477_v34 = vld [vmem:[%s1422_s10 + $0x580] sm:$0xff]  ;;  %v394_v18 = vld [vmem:[%s1422_s10 + $0x2e8] sm:$0xff] }
  0x6e   : > { %v443_v33 = vld [vmem:[%s1422_s10 + $0x470] sm:$0xff]  ;;  %648 = vmatpush.msrb.mxu0 %v445_v29  ;;  %v505_v35 = vld [vmem:[%s1422_s10 + $0x660] sm:$0xff]  ;;  %689 = vmatpush.msrb.mxu2 %v507_v31  ;;  %v318_v19 = vld [vmem:[%s1422_s10 + $0x88] sm:$0xff] }
  0x6f   : > { %667 = vmatpush.msrb.mxu1 %v479_v30  ;;  %v531_v36 = vld [vmem:[%s1422_s10 + $0x730] sm:$0xff]  ;;  %712 = vmatpush.msrb.mxu3 %v533_v32  ;;  %v441_v37 = vld [vmem:[%s1422_s10 + $0x460] sm:$0xff]  ;;  %v424_v20 = vld [vmem:[%s1422_s10 + $0x3d8] sm:$0xff] }
  0x70   : > { %v475_v38 = vld [vmem:[%s1422_s10 + $0x570] sm:$0xff]  ;;  %649 = vmatpush.msrb.mxu0 %v443_v33  ;;  %v529_v40 = vld [vmem:[%s1422_s10 + $0x720] sm:$0xff]  ;;  %690 = vmatpush.msrb.mxu2 %v505_v35  ;;  %v358_v21 = vld [vmem:[%s1422_s10 + $0x1c8] sm:$0xff] }
  0x71   : > { %668 = vmatpush.msrb.mxu1 %v477_v34  ;;  %v503_v39 = vld [vmem:[%s1422_s10 + $0x650] sm:$0xff]  ;;  %713 = vmatpush.msrb.mxu3 %v531_v36  ;;  %v473_v42 = vld [vmem:[%s1422_s10 + $0x560] sm:$0xff]  ;;  %v392_v22 = vld [vmem:[%s1422_s10 + $0x2d8] sm:$0xff] }
  0x72   : > { %v439_v41 = vld [vmem:[%s1422_s10 + $0x450] sm:$0xff]  ;;  %650 = vmatpush.msrb.mxu0 %v441_v37  ;;  %v501_v43 = vld [vmem:[%s1422_s10 + $0x640] sm:$0xff]  ;;  %691 = vmatpush.msrb.mxu2 %v503_v39  ;;  %v316_v23 = vld [vmem:[%s1422_s10 + $0x78] sm:$0xff] }
  0x73   : > { %669 = vmatpush.msrb.mxu1 %v475_v38  ;;  %v527_v44 = vld [vmem:[%s1422_s10 + $0x710] sm:$0xff]  ;;  %714 = vmatpush.msrb.mxu3 %v529_v40  ;;  %v437_v46 = vld [vmem:[%s1422_s10 + $0x440] sm:$0xff]  ;;  %v422_v24 = vld [vmem:[%s1422_s10 + $0x3c8] sm:$0xff] }
  0x74   : > { %v1537_v45 = vld [vmem:[#allocation2 + $0x10] sm:$0xff]  ;;  %651 = vmatpush.msrb.mxu0 %v439_v41  ;;  %692 = vmatpush.msrb.mxu2 %v501_v43  ;;  %v1543_v50 = vld [vmem:[#allocation2] sm:$0xff]  ;;  %v356_v25 = vld [vmem:[%s1422_s10 + $0x1b8] sm:$0xff] }
  0x75   : > { %670 = vmatpush.msrb.mxu1 %v473_v42  ;;  %v471_v47 = vld [vmem:[%s1422_s10 + $0x550] sm:$0xff]  ;;  %715 = vmatpush.msrb.mxu3 %v527_v44  ;;  %v525_v49 = vld [vmem:[%s1422_s10 + $0x700] sm:$0xff]  ;;  %v390_v26 = vld [vmem:[%s1422_s10 + $0x2c8] sm:$0xff] }
  0x76   : > { %v499_v48 = vld [vmem:[%s1422_s10 + $0x630] sm:$0xff]  ;;  %617 = vmatmul.f32.vlgmr.msra.gmra.mxu2 %v1537_v45  ;;  %652 = vmatpush.msrb.mxu0 %v437_v46  ;;  %v469_v54 = vld [vmem:[%s1422_s10 + $0x540] sm:$0xff]  ;;  %v314_v27 = vld [vmem:[%s1422_s10 + $0x68] sm:$0xff] }
  0x77   : > { %v435_v52 = vld [vmem:[%s1422_s10 + $0x430] sm:$0xff]  ;;  %671 = vmatpush.msrb.mxu1 %v471_v47  ;;  %693 = vmatpush.msrb.mxu2 %v499_v48  ;;  %v497_v55 = vld [vmem:[%s1422_s10 + $0x620] sm:$0xff]  ;;  %v420_v28 = vld [vmem:[%s1422_s10 + $0x3b8] sm:$0xff] }
  0x78   : > { %716 = vmatpush.msrb.mxu3 %v525_v49  ;;  %577 = vmatmul.f32.vlgmr.msra.gmra.mxu0 %v1543_v50  ;;  %v433_v58 = vld [vmem:[%s1422_s10 + $0x420] sm:$0xff]  ;;  %v467_v59 = vld [vmem:[%s1422_s10 + $0x530] sm:$0xff]  ;;  %v354_v29 = vld [vmem:[%s1422_s10 + $0x1a8] sm:$0xff] }
  0x79   : > { %637 = vmatmul.f32.vlgmr.msra.gmra.mxu3 %v1546_v51  ;;  %653 = vmatpush.msrb.mxu0 %v435_v52  ;;  %v495_v60 = vld [vmem:[%s1422_s10 + $0x610] sm:$0xff]  ;;  %v465_v63 = vld [vmem:[%s1422_s10 + $0x520] sm:$0xff]  ;;  %v388_v30 = vld [vmem:[%s1422_s10 + $0x2b8] sm:$0xff] }
  0x7a   : > { %721 = vmatpush.msra.mxu3 %v332_v53  ;;  %672 = vmatpush.msrb.mxu1 %v469_v54  ;;  %v431_v62 = vld [vmem:[%s1422_s10 + $0x410] sm:$0xff]  ;;  %v493_v0 = vld [vmem:[%s1422_s10 + $0x600] sm:$0xff]  ;;  %v312_v31 = vld [vmem:[%s1422_s10 + $0x58] sm:$0xff] }
  0x7b   : > { %694 = vmatpush.msrb.mxu2 %v497_v55  ;;  %597 = vmatmul.f32.vlgmr.msra.gmra.mxu1 %v1553_v56  ;;  %v1565_v1 = vld [vmem:[#allocation2 + $0x30] sm:$0xff]  ;;  %v1570_v5 = vld [vmem:[#allocation2 + $0x20] sm:$0xff]  ;;  %v418_v32 = vld [vmem:[%s1422_s10 + $0x3a8] sm:$0xff] }
  0x7c   : > { %722 = vmatpush.msra.mxu3 %v330_v57  ;;  %654 = vmatpush.msrb.mxu0 %v433_v58  ;;  %v429_v3 = vld [vmem:[%s1422_s10 + $0x400] sm:$0xff]  ;;  %v463_v4 = vld [vmem:[%s1422_s10 + $0x510] sm:$0xff]  ;;  %v352_v33 = vld [vmem:[%s1422_s10 + $0x198] sm:$0xff] }
  0x7d   : > { %673 = vmatpush.msrb.mxu1 %v467_v59  ;;  %695 = vmatpush.msrb.mxu2 %v495_v60  ;;  %v461_v9 = vld [vmem:[%s1422_s10 + $0x500] sm:$0xff]  ;;  %v386_v34 = vld [vmem:[%s1422_s10 + $0x2a8] sm:$0xff]  ;;  %v416_v36 = vld [vmem:[%s1422_s10 + $0x398] sm:$0xff] }
  0x7e   : > { %723 = vmatpush.msra.mxu3 %v328_v61  ;;  %655 = vmatpush.msrb.mxu0 %v431_v62  ;;  %v310_v35 = vld [vmem:[%s1422_s10 + $0x48] sm:$0xff]  ;;  %v384_v38 = vld [vmem:[%s1422_s10 + $0x298] sm:$0xff] }
  0x7f   : > { %674 = vmatpush.msrb.mxu1 %v465_v63  ;;  %696 = vmatpush.msrb.mxu2 %v493_v0  ;;  %v350_v37 = vld [vmem:[%s1422_s10 + $0x188] sm:$0xff]  ;;  %v308_v39 = vld [vmem:[%s1422_s10 + $0x38] sm:$0xff] }
  0x80   : > { %697 = vmatmul.f32.vlgmr.msrb.gmra.mxu2 %v1565_v1  ;;  %724 = vmatpush.msra.mxu3 %v326_v2  ;;  %v414_v40 = vld [vmem:[%s1422_s10 + $0x388] sm:$0xff]  ;;  %v348_v41 = vld [vmem:[%s1422_s10 + $0x178] sm:$0xff] }
  0x81   : > { %656 = vmatpush.msrb.mxu0 %v429_v3  ;;  %675 = vmatpush.msrb.mxu1 %v463_v4  ;;  %v382_v42 = vld [vmem:[%s1422_s10 + $0x288] sm:$0xff]  ;;  %v412_v44 = vld [vmem:[%s1422_s10 + $0x378] sm:$0xff] }
  0x82   : > { %657 = vmatmul.f32.vlgmr.msrb.gmra.mxu0 %v1570_v5  ;;  %1080 = vmatmul.msk.f32.vlgmr.msrb.gmra.mxu3 %vm557_vm0, %v1572_v6  ;;  %v306_v43 = vld [vmem:[%s1422_s10 + $0x28] sm:$0xff]  ;;  %v380_v47 = vld [vmem:[%s1422_s10 + $0x278] sm:$0xff] }
  0x83   : > { %725 = vmatpush.msra.mxu3 %v324_v7  ;;  %741 = vmatpush.msra.mxu0 %v364_v8  ;;  %v346_v46 = vld [vmem:[%s1422_s10 + $0x168] sm:$0xff]  ;;  %v304_v48 = vld [vmem:[%s1422_s10 + $0x18] sm:$0xff] }
  0x84   : > { %676 = vmatpush.msrb.mxu1 %v461_v9  ;;  %781 = vmatpush.msra.mxu2 %v428_v10  ;;  %v410_v49 = vld [vmem:[%s1422_s10 + $0x368] sm:$0xff]  ;;  %v344_v52 = vld [vmem:[%s1422_s10 + $0x158] sm:$0xff] }
  0x85   : > { %677 = vmatmul.f32.vlgmr.msrb.gmra.mxu1 %v1582_v11  ;;  %726 = vmatpush.msra.mxu3 %v322_v12  ;;  %v378_v53 = vld [vmem:[%s1422_s10 + $0x268] sm:$0xff]  ;;  %v408_v55 = vld [vmem:[%s1422_s10 + $0x358] sm:$0xff] }
  0x86   : > { %742 = vmatpush.msra.mxu0 %v362_v13  ;;  %761 = vmatpush.msra.mxu1 %v396_v14  ;;  %v302_v54 = vld [vmem:[%s1422_s10 + $0x8] sm:$0xff]  ;;  %v376_v58 = vld [vmem:[%s1422_s10 + $0x258] sm:$0xff] }
  0x87   : > { %727 = vmatpush.msra.mxu3 %v320_v15  ;;  %782 = vmatpush.msra.mxu2 %v426_v16  ;;  %v342_v57 = vld [vmem:[%s1422_s10 + $0x148] sm:$0xff]  ;;  %v460_v59 = vld [vmem:[%s1422_s10 + $0x4f8] sm:$0xff] }
  0x88   : > { %743 = vmatpush.msra.mxu0 %v360_v17  ;;  %762 = vmatpush.msra.mxu1 %v394_v18  ;;  %v406_v60 = vld [vmem:[%s1422_s10 + $0x348] sm:$0xff]  ;;  %v340_v61 = vld [vmem:[%s1422_s10 + $0x138] sm:$0xff] }
  0x89   : > { %728 = vmatpush.msra.mxu3 %v318_v19  ;;  %783 = vmatpush.msra.mxu2 %v424_v20  ;;  %v374_v62 = vld [vmem:[%s1422_s10 + $0x248] sm:$0xff]  ;;  %v404_v0 = vld [vmem:[%s1422_s10 + $0x338] sm:$0xff] }
  0x8a   : > { %744 = vmatpush.msra.mxu0 %v358_v21  ;;  %763 = vmatpush.msra.mxu1 %v392_v22  ;;  %v458_v63 = vld [vmem:[%s1422_s10 + $0x4e8] sm:$0xff]  ;;  %v372_v3 = vld [vmem:[%s1422_s10 + $0x238] sm:$0xff] }
  0x8b   : > { %729 = vmatpush.msra.mxu3 %v316_v23  ;;  %784 = vmatpush.msra.mxu2 %v422_v24  ;;  %v338_v2 = vld [vmem:[%s1422_s10 + $0x128] sm:$0xff]  ;;  %v456_v4 = vld [vmem:[%s1422_s10 + $0x4d8] sm:$0xff] }
  0x8c   : > { %745 = vmatpush.msra.mxu0 %v356_v25  ;;  %764 = vmatpush.msra.mxu1 %v390_v26  ;;  %v402_v7 = vld [vmem:[%s1422_s10 + $0x328] sm:$0xff]  ;;  %v336_v8 = vld [vmem:[%s1422_s10 + $0x118] sm:$0xff] }
  0x8d   : > { %730 = vmatpush.msra.mxu3 %v314_v27  ;;  %785 = vmatpush.msra.mxu2 %v420_v28  ;;  %v370_v9 = vld [vmem:[%s1422_s10 + $0x228] sm:$0xff]  ;;  %v400_v12 = vld [vmem:[%s1422_s10 + $0x318] sm:$0xff] }
  0x8e   : > { %746 = vmatpush.msra.mxu0 %v354_v29  ;;  %765 = vmatpush.msra.mxu1 %v388_v30  ;;  %v454_v10 = vld [vmem:[%s1422_s10 + $0x4c8] sm:$0xff]  ;;  %v368_v14 = vld [vmem:[%s1422_s10 + $0x218] sm:$0xff] }
  0x8f   : > { %731 = vmatpush.msra.mxu3 %v312_v31  ;;  %786 = vmatpush.msra.mxu2 %v418_v32  ;;  %v334_v13 = vld [vmem:[%s1422_s10 + $0x108] sm:$0xff]  ;;  %v452_v15 = vld [vmem:[%s1422_s10 + $0x4b8] sm:$0xff] }
  0x90   : > { %747 = vmatpush.msra.mxu0 %v352_v33  ;;  %766 = vmatpush.msra.mxu1 %v386_v34  ;;  %v492_v16 = vld [vmem:[%s1422_s10 + $0x5f8] sm:$0xff]  ;;  %v366_v17 = vld [vmem:[%s1422_s10 + $0x208] sm:$0xff] }
  0x91   : > { %732 = vmatpush.msra.mxu3 %v310_v35  ;;  %787 = vmatpush.msra.mxu2 %v416_v36  ;;  %v398_v18 = vld [vmem:[%s1422_s10 + $0x308] sm:$0xff]  ;;  %v524_v21 = vld [vmem:[%s1422_s10 + $0x6f8] sm:$0xff] }
  0x92   : > { %748 = vmatpush.msra.mxu0 %v350_v37  ;;  %767 = vmatpush.msra.mxu1 %v384_v38  ;;  %v450_v19 = vld [vmem:[%s1422_s10 + $0x4a8] sm:$0xff]  ;;  %v448_v23 = vld [vmem:[%s1422_s10 + $0x498] sm:$0xff] }
  0x93   : > { %733 = vmatpush.msra.mxu3 %v308_v39  ;;  %788 = vmatpush.msra.mxu2 %v414_v40  ;;  %v490_v20 = vld [vmem:[%s1422_s10 + $0x5e8] sm:$0xff]  ;;  %v488_v24 = vld [vmem:[%s1422_s10 + $0x5d8] sm:$0xff] }
  0x94   : > { %749 = vmatpush.msra.mxu0 %v348_v41  ;;  %768 = vmatpush.msra.mxu1 %v382_v42  ;;  %v550_v22 = vld [vmem:[%s1422_s10 + $0x7c8] sm:$0xff]  ;;  %v548_v26 = vld [vmem:[%s1422_s10 + $0x7b8] sm:$0xff] }
  0x95   : > { %734 = vmatpush.msra.mxu3 %v306_v43  ;;  %789 = vmatpush.msra.mxu2 %v412_v44  ;;  %v522_v25 = vld [vmem:[%s1422_s10 + $0x6e8] sm:$0xff]  ;;  %v520_v29 = vld [vmem:[%s1422_s10 + $0x6d8] sm:$0xff] }
  0x96   : > { %750 = vmatpush.msra.mxu0 %v346_v46  ;;  %769 = vmatpush.msra.mxu1 %v380_v47  ;;  %v446_v27 = vld [vmem:[%s1422_s10 + $0x488] sm:$0xff]  ;;  %v444_v31 = vld [vmem:[%s1422_s10 + $0x478] sm:$0xff] }
  0x97   : > { %735 = vmatpush.msra.mxu3 %v304_v48  ;;  %790 = vmatpush.msra.mxu2 %v410_v49  ;;  %v486_v28 = vld [vmem:[%s1422_s10 + $0x5c8] sm:$0xff]  ;;  %v484_v32 = vld [vmem:[%s1422_s10 + $0x5b8] sm:$0xff] }
  0x98   : > { %751 = vmatpush.msra.mxu0 %v344_v52  ;;  %770 = vmatpush.msra.mxu1 %v378_v53  ;;  %v546_v30 = vld [vmem:[%s1422_s10 + $0x7a8] sm:$0xff]  ;;  %v544_v34 = vld [vmem:[%s1422_s10 + $0x798] sm:$0xff] }
  0x99   : > { %736 = vmatpush.msra.mxu3 %v302_v54  ;;  %791 = vmatpush.msra.mxu2 %v408_v55  ;;  %v518_v33 = vld [vmem:[%s1422_s10 + $0x6c8] sm:$0xff]  ;;  %v516_v37 = vld [vmem:[%s1422_s10 + $0x6b8] sm:$0xff] }
  0x9a   : > { %752 = vmatpush.msra.mxu0 %v342_v57  ;;  %771 = vmatpush.msra.mxu1 %v376_v58  ;;  %v442_v35 = vld [vmem:[%s1422_s10 + $0x468] sm:$0xff]  ;;  %v440_v39 = vld [vmem:[%s1422_s10 + $0x458] sm:$0xff] }
  0x9b   : > { %801 = vmatpush.msrb.mxu3 %v460_v59  ;;  %792 = vmatpush.msra.mxu2 %v406_v60  ;;  %v482_v36 = vld [vmem:[%s1422_s10 + $0x5a8] sm:$0xff]  ;;  %v480_v40 = vld [vmem:[%s1422_s10 + $0x598] sm:$0xff] }
  0x9c   : > { %753 = vmatpush.msra.mxu0 %v340_v61  ;;  %772 = vmatpush.msra.mxu1 %v374_v62  ;;  %v542_v38 = vld [vmem:[%s1422_s10 + $0x788] sm:$0xff]  ;;  %v540_v42 = vld [vmem:[%s1422_s10 + $0x778] sm:$0xff] }
  0x9d   : > { %802 = vmatpush.msrb.mxu3 %v458_v63  ;;  %793 = vmatpush.msra.mxu2 %v404_v0  ;;  %v514_v41 = vld [vmem:[%s1422_s10 + $0x6a8] sm:$0xff]  ;;  %v512_v46 = vld [vmem:[%s1422_s10 + $0x698] sm:$0xff] }
  0x9e   : > { %754 = vmatpush.msra.mxu0 %v338_v2  ;;  %773 = vmatpush.msra.mxu1 %v372_v3  ;;  %v438_v43 = vld [vmem:[%s1422_s10 + $0x448] sm:$0xff]  ;;  %v436_v47 = vld [vmem:[%s1422_s10 + $0x438] sm:$0xff] }
  0x9f   : > { %803 = vmatpush.msrb.mxu3 %v456_v4  ;;  %794 = vmatpush.msra.mxu2 %v402_v7  ;;  %v478_v44 = vld [vmem:[%s1422_s10 + $0x588] sm:$0xff]  ;;  %v476_v48 = vld [vmem:[%s1422_s10 + $0x578] sm:$0xff] }
  0xa0   : > { %755 = vmatpush.msra.mxu0 %v336_v8  ;;  %774 = vmatpush.msra.mxu1 %v370_v9  ;;  %v510_v49 = vld [vmem:[%s1422_s10 + $0x688] sm:$0xff]  ;;  %v508_v55 = vld [vmem:[%s1422_s10 + $0x678] sm:$0xff] }
  0xa1   : > { %804 = vmatpush.msrb.mxu3 %v454_v10  ;;  %795 = vmatpush.msra.mxu2 %v400_v12  ;;  %v538_v52 = vld [vmem:[%s1422_s10 + $0x768] sm:$0xff]  ;;  %v536_v57 = vld [vmem:[%s1422_s10 + $0x758] sm:$0xff] }
  0xa2   : > { %756 = vmatpush.msra.mxu0 %v334_v13  ;;  %775 = vmatpush.msra.mxu1 %v368_v14  ;;  %v434_v53 = vld [vmem:[%s1422_s10 + $0x428] sm:$0xff]  ;;  %v432_v58 = vld [vmem:[%s1422_s10 + $0x418] sm:$0xff]  ;;  %v897_v14 = vld [vmem:[%s1715_s13 + $0x70] sm:$0xff] }
  0xa3   : > { %805 = vmatpush.msrb.mxu3 %v452_v15  ;;  %796 = vmatpush.msra.mxu2 %v398_v18  ;;  %v474_v54 = vld [vmem:[%s1422_s10 + $0x568] sm:$0xff]  ;;  %v472_v59 = vld [vmem:[%s1422_s10 + $0x558] sm:$0xff]  ;;  %v891_v18 = vld [vmem:[%s1715_s13 + $0x40] sm:$0xff] }
  0xa4   : > { %821 = vmatpush.msrb.mxu0 %v492_v16  ;;  %776 = vmatpush.msra.mxu1 %v366_v17  ;;  %v534_v60 = vld [vmem:[%s1422_s10 + $0x748] sm:$0xff]  ;;  %v504_v63 = vld [vmem:[%s1422_s10 + $0x658] sm:$0xff]  ;;  %v895_v16 = vld [vmem:[%s1715_s13 + $0x60] sm:$0xff] }
  0xa5   : > { %806 = vmatpush.msrb.mxu3 %v450_v19  ;;  %864 = vmatpush.msrb.mxu2 %v550_v22  ;;  %v430_v61 = vld [vmem:[%s1422_s10 + $0x408] sm:$0xff]  ;;  %v532_v0 = vld [vmem:[%s1422_s10 + $0x738] sm:$0xff] }
  0xa6   : > { %822 = vmatpush.msrb.mxu0 %v490_v20  ;;  %841 = vmatpush.msrb.mxu1 %v524_v21  ;;  %v470_v62 = vld [vmem:[%s1422_s10 + $0x548] sm:$0xff]  ;;  %v468_v2 = vld [vmem:[%s1422_s10 + $0x538] sm:$0xff]  ;;  %v887_v21 = vld [vmem:[%s1715_s13 + $0x20] sm:$0xff] }
  0xa7   : > { %807 = vmatpush.msrb.mxu3 %v448_v23  ;;  %865 = vmatpush.msrb.mxu2 %v548_v26  ;;  %v502_v3 = vld [vmem:[%s1422_s10 + $0x648] sm:$0xff]  ;;  %v528_v8 = vld [vmem:[%s1422_s10 + $0x718] sm:$0xff]  ;;  %v885_v23 = vld [vmem:[%s1715_s13 + $0x10] sm:$0xff] }
  0xa8   : > { %823 = vmatpush.msrb.mxu0 %v488_v24  ;;  %842 = vmatpush.msrb.mxu1 %v522_v25  ;;  %v530_v4 = vld [vmem:[%s1422_s10 + $0x728] sm:$0xff]  ;;  %v464_v9 = vld [vmem:[%s1422_s10 + $0x518] sm:$0xff]  ;;  %v551_v25 = vld [vmem:[%s246_s20] sm:$0x3] }
  0xa9   : > { %808 = vmatpush.msrb.mxu3 %v446_v27  ;;  %866 = vmatpush.msrb.mxu2 %v546_v30  ;;  %v466_v7 = vld [vmem:[%s1422_s10 + $0x528] sm:$0xff]  ;;  %v883_v26 = vld [vmem:[%s1715_s13] sm:$0xff] }
  0xaa   : > { %824 = vmatpush.msrb.mxu0 %v486_v28  ;;  %843 = vmatpush.msrb.mxu1 %v520_v29  ;;  %v498_v10 = vld [vmem:[%s1422_s10 + $0x628] sm:$0xff]  ;;  %v913_v28 = vld [vmem:[%s1715_s13 + $0xf0] sm:$0xff]  ;;  %v553_v29 = vperm.slane %v551_v25, 0 }
  0xab   : > { %809 = vmatpush.msrb.mxu3 %v444_v31  ;;  %867 = vmatpush.msrb.mxu2 %v544_v34  ;;  %v526_v12 = vld [vmem:[%s1422_s10 + $0x708] sm:$0xff]  ;;  %v911_v31 = vld [vmem:[%s1715_s13 + $0xe0] sm:$0xff] }
  0xac   : > { %825 = vmatpush.msrb.mxu0 %v484_v32  ;;  %844 = vmatpush.msrb.mxu1 %v518_v33  ;;  %v494_v13 = vld [vmem:[%s1422_s10 + $0x608] sm:$0xff] }
  0xad   : > { %810 = vmatpush.msrb.mxu3 %v442_v35  ;;  %868 = vmatpush.msrb.mxu2 %v542_v38  ;;  %v896_v15 = vld [vmem:[%s1715_s13 + $0x68] sm:$0xff]  ;;  %v890_v19 = vld [vmem:[%s1715_s13 + $0x38] sm:$0xff] }
  0xae   : > { %826 = vmatpush.msrb.mxu0 %v482_v36  ;;  %845 = vmatpush.msrb.mxu1 %v516_v37  ;;  %v892_v17 = vld [vmem:[%s1715_s13 + $0x48] sm:$0xff]  ;;  %v886_v22 = vld [vmem:[%s1715_s13 + $0x18] sm:$0xff] }
  0xaf   : > { %811 = vmatpush.msrb.mxu3 %v440_v39  ;;  %869 = vmatpush.msrb.mxu2 %v540_v42  ;;  %v888_v20 = vld [vmem:[%s1715_s13 + $0x28] sm:$0xff]  ;;  %v914_v27 = vld [vmem:[%s1715_s13 + $0xf8] sm:$0xff] }
  0xb0   : > { %827 = vmatpush.msrb.mxu0 %v480_v40  ;;  %846 = vmatpush.msrb.mxu1 %v514_v41  ;;  %v884_v24 = vld [vmem:[%s1715_s13 + $0x8] sm:$0xff] }
  0xb1   : > { %812 = vmatpush.msrb.mxu3 %v438_v43  ;;  %870 = vmatpush.msrb.mxu2 %v538_v52  ;;  %v912_v30 = vld [vmem:[%s1715_s13 + $0xe8] sm:$0xff]  ;;  %v910_v52 = vld [vmem:[%s1715_s13 + $0xd8] sm:$0xff] }
  0xb2   : > { %828 = vmatpush.msrb.mxu0 %v478_v44  ;;  %847 = vmatpush.msrb.mxu1 %v512_v46 }
  0xb3   : > { %737 = vmatmul.f32.vlgmr.msra.gmra.mxu3 %v1543_v50  ;;  %v506_v50 = vld [vmem:[%s1422_s10 + $0x668] sm:$0xff]  ;;  %871 = vmatpush.msrb.mxu2 %v536_v57 }
  0xb4   : > { %813 = vmatpush.msrb.mxu3 %v436_v47  ;;  %829 = vmatpush.msrb.mxu0 %v476_v48  ;;  %v906_v57 = vld [vmem:[%s1715_s13 + $0xb8] sm:$0xff] }
  0xb5   : > { %848 = vmatpush.msrb.mxu1 %v510_v49  ;;  %872 = vmatpush.msrb.mxu2 %v534_v60  ;;  %v902_v60 = vld [vmem:[%s1715_s13 + $0x98] sm:$0xff] }
  0xb6   : > { %814 = vmatpush.msrb.mxu3 %v434_v53  ;;  %830 = vmatpush.msrb.mxu0 %v474_v54  ;;  %v909_v53 = vld [vmem:[%s1715_s13 + $0xd0] sm:$0xff]  ;;  %v908_v54 = vld [vmem:[%s1715_s13 + $0xc8] sm:$0xff] }
  0xb7   : > { %849 = vmatpush.msrb.mxu1 %v508_v55  ;;  %797 = vmatmul.f32.vlgmr.msra.gmra.mxu2 %v1546_v51  ;;  %v500_v51 = vld [vmem:[%s1422_s10 + $0x638] sm:$0xff]  ;;  %v907_v55 = vld [vmem:[%s1715_s13 + $0xc0] sm:$0xff] }
  0xb8   : > { %815 = vmatpush.msrb.mxu3 %v432_v58  ;;  %831 = vmatpush.msrb.mxu0 %v472_v59  ;;  %v905_v58 = vld [vmem:[%s1715_s13 + $0xb0] sm:$0xff]  ;;  %v904_v59 = vld [vmem:[%s1715_s13 + $0xa8] sm:$0xff] }
  0xb9   : > { %850 = vmatpush.msrb.mxu1 %v506_v50  ;;  %873 = vmatpush.msrb.mxu2 %v532_v0  ;;  %v903_v50 = vld [vmem:[%s1715_s13 + $0xa0] sm:$0xff]  ;;  %v554_v0 = vperm.slane %v551_v25, 1 }
  0xba   : > { %816 = vmatpush.msrb.mxu3 %v430_v61  ;;  %832 = vmatpush.msrb.mxu0 %v470_v62  ;;  %v901_v61 = vld [vmem:[%s1715_s13 + $0x90] sm:$0xff]  ;;  %v900_v62 = vld [vmem:[%s1715_s13 + $0x88] sm:$0xff] }
  0xbb   : > { %851 = vmatpush.msrb.mxu1 %v504_v63  ;;  %757 = vmatmul.f32.vlgmr.msra.gmra.mxu0 %v1553_v56  ;;  %v462_v56 = vld [vmem:[%s1422_s10 + $0x508] sm:$0xff]  ;;  %v899_v63 = vld [vmem:[%s1715_s13 + $0x80] sm:$0xff] }
  0xbc   : > { %817 = vmatmul.f32.vlgmr.msrb.gmra.mxu3 %v1570_v5  ;;  %833 = vmatpush.msrb.mxu0 %v468_v2  ;;  %v496_v5 = vld [vmem:[%s1422_s10 + $0x618] sm:$0xff] }
  0xbd   : > { %852 = vmatpush.msrb.mxu1 %v502_v3  ;;  %874 = vmatpush.msrb.mxu2 %v530_v4 }
  0xbe   : > { %777 = vmatmul.f32.vlgmr.msra.gmra.mxu1 %v1537_v45  ;;  %834 = vmatpush.msrb.mxu0 %v466_v7  ;;  %v898_v45 = vld [vmem:[%s1715_s13 + $0x78] sm:$0xff] }
  0xbf   : > { %853 = vmatpush.msrb.mxu1 %v500_v51  ;;  %875 = vmatpush.msrb.mxu2 %v528_v8 }
  0xc0   : > { %835 = vmatpush.msrb.mxu0 %v464_v9  ;;  %935 = vmatpush.msra.mxu3 %v914_v27 }
  0xc1   : > { %854 = vmatpush.msrb.mxu1 %v498_v10  ;;  %876 = vmatpush.msrb.mxu2 %v526_v12 }
  0xc2   : > { %1081 = vmatmul.msk.f32.vlgmr.msrb.gmra.mxu2 %vm557_vm0, %v1572_v6  ;;  %836 = vmatpush.msrb.mxu0 %v462_v56  ;;  %v894_v6 = vld [vmem:[%s1715_s13 + $0x58] sm:$0xff] }
  0xc3   : > { %855 = vmatpush.msrb.mxu1 %v496_v5  ;;  %837 = vmatmul.f32.vlgmr.msrb.gmra.mxu0 %v1582_v11  ;;  %v893_v11 = vld [vmem:[%s1715_s13 + $0x50] sm:$0xff] }
  0xc4   : > { %915 = vmatpush.msra.mxu2 %v898_v45  ;;  %936 = vmatpush.msra.mxu3 %v913_v28 }
  0xc5   : > { %856 = vmatpush.msrb.mxu1 %v494_v13 }
  0xc6   : > { %857 = vmatmul.f32.vlgmr.msrb.gmra.mxu1 %v1565_v1  ;;  %916 = vmatpush.msra.mxu2 %v897_v14  ;;  %v889_v1 = vld [vmem:[%s1715_s13 + $0x30] sm:$0xff] }
  0xc7   : > { %937 = vmatpush.msra.mxu3 %v912_v30 }
  0xc8   : > { %917 = vmatpush.msra.mxu2 %v896_v15 }
  0xc9   : > { %938 = vmatpush.msra.mxu3 %v911_v31 }
  0xca   : > { %918 = vmatpush.msra.mxu2 %v895_v16 }
  0xcb   : > { %939 = vmatpush.msra.mxu3 %v910_v52 }
  0xcc   : > { %919 = vmatpush.msra.mxu2 %v894_v6 }
  0xcd   : > { %940 = vmatpush.msra.mxu3 %v909_v53 }
  0xce   : > { %920 = vmatpush.msra.mxu2 %v893_v11 }
  0xcf   : > { %941 = vmatpush.msra.mxu3 %v908_v54 }
  0xd0   : > { %921 = vmatpush.msra.mxu2 %v892_v17 }
  0xd1   : > { %942 = vmatpush.msra.mxu3 %v907_v55 }
  0xd2   : > { %922 = vmatpush.msra.mxu2 %v891_v18 }
  0xd3   : > { %943 = vmatpush.msra.mxu3 %v906_v57 }
  0xd4   : > { %923 = vmatpush.msra.mxu2 %v890_v19 }
  0xd5   : > { %944 = vmatpush.msra.mxu3 %v905_v58 }
  0xd6   : > { %924 = vmatpush.msra.mxu2 %v889_v1 }
  0xd7   : > { %945 = vmatpush.msra.mxu3 %v904_v59 }
  0xd8   : > { %925 = vmatpush.msra.mxu2 %v888_v20 }
  0xd9   : > { %946 = vmatpush.msra.mxu3 %v903_v50 }
  0xda   : > { %926 = vmatpush.msra.mxu2 %v887_v21 }
  0xdb   : > { %947 = vmatpush.msra.mxu3 %v902_v60 }
  0xdc   : > { %927 = vmatpush.msra.mxu2 %v886_v22 }
  0xdd   : > { %948 = vmatpush.msra.mxu3 %v901_v61 }
  0xde   : > { %928 = vmatpush.msra.mxu2 %v885_v23 }
  0xdf   : > { %949 = vmatpush.msra.mxu3 %v900_v62 }
  0xe0   : > { %929 = vmatpush.msra.mxu2 %v884_v24 }
  0xe1   : > { %950 = vmatpush.msra.mxu3 %v899_v63 }
  0xe2   : > { %930 = vmatpush.msra.mxu2 %v883_v26 }
  0xf5   : > { %v578_v32 = vpop.f32.mrf.mxu0 }
  0xf6   : > { %v579_v33 = vadd.f32 %v578_v32, %v553_v29 }
  0xf8   : > { %v598_v34 = vpop.f32.mrf.mxu1 }
  0xf9   : > { %v599_v35 = vadd.f32 %v598_v34, %v579_v33  ;;  %v618_v36 = vpop.f32.mrf.mxu2 }
  0xfb   : > { %v619_v37 = vadd.f32 %v618_v36, %v599_v35 }
  0xfc   : > { %v638_v38 = vpop.f32.mrf.mxu3 }
  0xfd   : > { %v639_v39 = vadd.f32 %v638_v38, %v619_v37 }
  0xff   : > { %v658_v40 = vpop.f32.mrf.mxu0 }
 0x100   : > { %v659_v41 = vadd.f32 %v658_v40, %v639_v39 }
 0x102   : > { %v678_v42 = vpop.f32.mrf.mxu1 }
 0x103   : > { %v679_v43 = vadd.f32 %v678_v42, %v659_v41  ;;  %v698_v44 = vpop.f32.mrf.mxu2 }
 0x105   : > { %v699_v46 = vadd.f32 %v698_v44, %v679_v43  ;;  %v718_v47 = vpop.f32.mrf.mxu3 }
 0x107   : > { %v719_v48 = vadd.f32 %v718_v47, %v699_v46 }
 0x109   : > { %1145 = vtanh.f32 %v719_v48 }
 0x10f   : > { %v1146_v49 = vpop.eup %1145 }
 0x110   : > { %931 = vmatmul.f32.vlgmr.msra.gmra.mxu2 %v1146_v49 }
 0x136   : > { %v738_v2 = vpop.f32.mrf.mxu3 }
 0x137   : > { %v739_v3 = vadd.f32 %v738_v2, %v554_v0 }
 0x138   : > { %v758_v4 = vpop.f32.mrf.mxu0 }
 0x139   : > { %v759_v7 = vadd.f32 %v758_v4, %v739_v3 }
 0x13a   : > { %v798_v9 = vpop.f32.mrf.mxu2 }
 0x13b   : > { %v778_v51 = vpop.f32.mrf.mxu1 }
 0x13c   : > { %v779_v8 = vadd.f32 %v778_v51, %v759_v7 }
 0x13e   : > { %v799_v10 = vadd.f32 %v798_v9, %v779_v8 }
 0x13f   : > { %v818_v12 = vpop.f32.mrf.mxu3 }
 0x140   : > { %v819_v56 = vadd.f32 %v818_v12, %v799_v10  ;;  %v838_v5 = vpop.f32.mrf.mxu0 }
 0x142   : > { %v839_v45 = vadd.f32 %v838_v5, %v819_v56 }
 0x143   : > { %v858_v13 = vpop.f32.mrf.mxu1 }
 0x144   : > { %v859_v14 = vadd.f32 %v858_v13, %v839_v45 }
 0x145   : > { %v878_v15 = vpop.f32.mrf.mxu2 }
 0x146   : > { %v879_v16 = vadd.f32 %v878_v15, %v859_v14 }
 0x148   : > { %1147 = vtanh.f32 %v879_v16 }
 0x14e   : > { %v1148_v6 = vpop.eup %1147 }
 0x14f   : > { %951 = vmatmul.f32.vlgmr.msra.gmra.mxu3 %v1148_v6 }
 0x193   : > { %v932_v11 = vpop.f32.mrf.mxu2 }
 0x1d2   : > { %v952_v17 = vpop.f32.mrf.mxu3 }
 0x1d3   : > { %v953_v18 = vadd.f32 %v952_v17, %v932_v11 }
 0x1d5   : > { %956 = vst.msk [vmem:[%s292_s24] sm:$0xff] %vm955_vm1, %v953_v18 }
 0x1d6 PF: > { %p15_p1 = scmp.ge.s32.totalorder %s1329_s19, 4   ;;  %s1785_s15 = smov %s1269_s16 }
 0x1d7   : > { %s1786_s16 = smov %s1273_s17  ;;  %s1787_s17 = smov %s1339_s22 }
 0x1d8   : > { %s1788_s18 = smov %s1329_s19  ;;  %17 = sbr.rel (!%p15_p1) target bundleno = 4 (0x4), region = 95 }
 0x1dd   :  { %976 = vsyncpa [#allocation3], 1 }
 0x1de   :  { %978 = vsyncpa [#allocation3 + $0x1], 1 }
 0x1df   :  { %979 = vsyncpa [#allocation5], 1 }
 0x1e0   :  { %981 = vsyncpa [#allocation5 + $0x1], 1 }

</bundles_post_ra>
